<compile_context>
chip_gen: v6e
topology: v6e:2x2x1
jax: 0.10.0
libtpu: 0.0.40
codegen_flags: <defaults>
</compile_context>

<pallas_src>
import math
import functools

import jax
import jax.numpy as jnp
from jax.experimental import pallas as pl
from jax.experimental.pallas import tpu as pltpu


# ---------------------------------------------------------------------------
# Kernel 1: fused Q/K/V projections  (one launch, three matmuls per row-tile)
# ---------------------------------------------------------------------------
def _qkv_proj_kernel(xq_ref, xk_ref, xv_ref,
                     wq_ref, wk_ref, wv_ref,
                     bq_ref, bk_ref, bv_ref,
                     qo_ref, ko_ref, vo_ref):
    qo_ref[...] = (jnp.dot(xq_ref[...], wq_ref[...],
                           preferred_element_type=jnp.float32)
                   + bq_ref[...]).astype(qo_ref.dtype)
    ko_ref[...] = (jnp.dot(xk_ref[...], wk_ref[...],
                           preferred_element_type=jnp.float32)
                   + bk_ref[...]).astype(ko_ref.dtype)
    vo_ref[...] = (jnp.dot(xv_ref[...], wv_ref[...],
                           preferred_element_type=jnp.float32)
                   + bv_ref[...]).astype(vo_ref.dtype)


def qkv_projection(xq, xk, xv, params, *, tm_max=256):
    """xq/xk/xv: (M, D) with identical M.  Returns (M, H*dk), (M, H*dk), (M, H*dv)."""
    M, D = xq.shape
    Nq = params["w_qs"].shape[1]
    Nv = params["w_vs"].shape[1]
    tm = M if M <= tm_max else tm_max
    return pl.pallas_call(
        _qkv_proj_kernel,
        out_shape=(
            jax.ShapeDtypeStruct((M, Nq), xq.dtype),
            jax.ShapeDtypeStruct((M, Nq), xk.dtype),
            jax.ShapeDtypeStruct((M, Nv), xv.dtype),
        ),
        grid=(pl.cdiv(M, tm),),
        in_specs=[
            pl.BlockSpec((tm, D), lambda i: (i, 0)),
            pl.BlockSpec((tm, D), lambda i: (i, 0)),
            pl.BlockSpec((tm, D), lambda i: (i, 0)),
            pl.BlockSpec((D, Nq), lambda i: (0, 0)),   # weights stay VMEM-resident
            pl.BlockSpec((D, Nq), lambda i: (0, 0)),
            pl.BlockSpec((D, Nv), lambda i: (0, 0)),
            pl.BlockSpec((1, Nq), lambda i: (0, 0)),   # biases pinned (no re-DMA)
            pl.BlockSpec((1, Nq), lambda i: (0, 0)),
            pl.BlockSpec((1, Nv), lambda i: (0, 0)),
        ],
        out_specs=(
            pl.BlockSpec((tm, Nq), lambda i: (i, 0)),
            pl.BlockSpec((tm, Nq), lambda i: (i, 0)),
            pl.BlockSpec((tm, Nv), lambda i: (i, 0)),
        ),
        compiler_params=pltpu.CompilerParams(dimension_semantics=("parallel",)),
    )(xq, xk, xv,
      params["w_qs"], params["w_ks"], params["w_vs"],
      params["b_qs"].reshape(1, Nq), params["b_ks"].reshape(1, Nq),
      params["b_vs"].reshape(1, Nv))


# Fallback single linear (only used when len_q != len_k, e.g. cross-attention).
def _linear_kernel(x_ref, w_ref, b_ref, o_ref):
    o_ref[...] = (jnp.dot(x_ref[...], w_ref[...],
                          preferred_element_type=jnp.float32)
                  + b_ref[...]).astype(o_ref.dtype)


def linear(x, w, b, *, tm_max=256):
    M, K = x.shape
    N = w.shape[1]
    tm = M if M <= tm_max else tm_max
    return pl.pallas_call(
        _linear_kernel,
        out_shape=jax.ShapeDtypeStruct((M, N), x.dtype),
        grid=(pl.cdiv(M, tm),),
        in_specs=[
            pl.BlockSpec((tm, K), lambda i: (i, 0)),
            pl.BlockSpec((K, N), lambda i: (0, 0)),
            pl.BlockSpec((1, N), lambda i: (0, 0)),
        ],
        out_specs=pl.BlockSpec((tm, N), lambda i: (i, 0)),
        compiler_params=pltpu.CompilerParams(dimension_semantics=("parallel",)),
    )(x, w, b.reshape(1, N))


# ---------------------------------------------------------------------------
# Kernel 2: per-batch attention (all heads) + fc + residual + LayerNorm
# ---------------------------------------------------------------------------
def _attn_fc_ln_kernel(qp_ref, kp_ref, vp_ref, res_ref,
                       wfc_ref, bfc_ref, g_ref, beta_ref,
                       out_ref, attn_ref,
                       *, n_head, d_k, d_v, scale, eps):
    # (len_q, H*d_k) etc. — fold 1/temperature into q once (cheap VALU mul).
    qp = qp_ref[0].astype(jnp.float32) * scale
    kp = kp_ref[0].astype(jnp.float32)
    vp = vp_ref[0].astype(jnp.float32)

    ctx = []
    for h in range(n_head):                       # static unroll over heads
        qh = qp[:, h * d_k:(h + 1) * d_k]         # (len_q, d_k)
        kh = kp[:, h * d_k:(h + 1) * d_k]         # (len_k, d_k)
        vh = vp[:, h * d_v:(h + 1) * d_v]         # (len_k, d_v)

        # scores via dot_general contracting the feature dim (no K transpose).
        s = jax.lax.dot_general(qh, kh, (((1,), (1,)), ((), ())),
                                preferred_element_type=jnp.float32)
        s_max = jnp.max(s, axis=-1, keepdims=True)
        p = jnp.exp(s - s_max)
        denom = jnp.sum(p, axis=-1, keepdims=True)
        attn_h = p * pl.reciprocal(denom, approx=True)   # EUP vrcp, off VALU path

        attn_ref[h, 0] = attn_h.astype(attn_ref.dtype)
        ctx.append(jnp.dot(attn_h, vh, preferred_element_type=jnp.float32))

    # Head merge in-VMEM (no HBM transpose), then one wide fc matmul.
    context = jnp.concatenate(ctx, axis=-1)                      # (len_q, H*d_v)
    y = jnp.dot(context, wfc_ref[...], preferred_element_type=jnp.float32)
    y = y + bfc_ref[...]

    # Residual + LayerNorm (biased variance, matching nn.LayerNorm), all in f32.
    x = y + res_ref[0].astype(jnp.float32)
    mean = jnp.mean(x, axis=-1, keepdims=True)
    var = jnp.mean((x - mean) ** 2, axis=-1, keepdims=True)
    normed = (x - mean) * jax.lax.rsqrt(var + eps)
    out_ref[0] = (normed * g_ref[...] + beta_ref[...]).astype(out_ref.dtype)


def attention_fc_layernorm(qp, kp, vp, residual, params,
                           *, n_head, d_k, d_v, eps=1e-5):
    sz_b, len_q, _ = qp.shape
    _, len_k, _ = kp.shape
    d_model = residual.shape[-1]
    scale = 1.0 / math.sqrt(d_k)
    kernel = functools.partial(_attn_fc_ln_kernel, n_head=n_head, d_k=d_k,
                               d_v=d_v, scale=scale, eps=eps)
    return pl.pallas_call(
        kernel,
        out_shape=(
            jax.ShapeDtypeStruct((sz_b, len_q, d_model), residual.dtype),
            jax.ShapeDtypeStruct((n_head, sz_b, len_q, len_k), jnp.float32),
        ),
        grid=(sz_b,),
        in_specs=[
            pl.BlockSpec((1, len_q, n_head * d_k), lambda b: (b, 0, 0)),
            pl.BlockSpec((1, len_k, n_head * d_k), lambda b: (b, 0, 0)),
            pl.BlockSpec((1, len_k, n_head * d_v), lambda b: (b, 0, 0)),
            pl.BlockSpec((1, len_q, d_model), lambda b: (b, 0, 0)),
            pl.BlockSpec((n_head * d_v, d_model), lambda b: (0, 0)),
            pl.BlockSpec((1, d_model), lambda b: (0, 0)),
            pl.BlockSpec((1, d_model), lambda b: (0, 0)),
            pl.BlockSpec((1, d_model), lambda b: (0, 0)),
        ],
        out_specs=(
            pl.BlockSpec((1, len_q, d_model), lambda b: (b, 0, 0)),
            pl.BlockSpec((n_head, 1, len_q, len_k), lambda b: (0, b, 0, 0)),
        ),
        compiler_params=pltpu.CompilerParams(dimension_semantics=("parallel",)),
    )(qp, kp, vp, residual,
      params["w_fc"], params["b_fc"].reshape(1, d_model),
      params["ln_g"].reshape(1, d_model), params["ln_b"].reshape(1, d_model))


# ---------------------------------------------------------------------------
# Parameter init (mirrors the PyTorch __init__ shapes & statistics)
# ---------------------------------------------------------------------------
def init_params(key, n_head, d_model, d_k, d_v):
    ks = jax.random.split(key, 8)
    std_qk = math.sqrt(2.0 / (d_model + d_k))
    std_v = math.sqrt(2.0 / (d_model + d_v))
    std_fc = math.sqrt(2.0 / (n_head * d_v + d_model))   # xavier_normal
    bnd_in = 1.0 / math.sqrt(d_model)                    # PyTorch default bias init
    bnd_fc = 1.0 / math.sqrt(n_head * d_v)
    f32 = jnp.float32
    return {
        # weights stored as (in_features, out_features) so forward is x @ w
        "w_qs": std_qk * jax.random.normal(ks[0], (d_model, n_head * d_k), f32),
        "w_ks": std_qk * jax.random.normal(ks[1], (d_model, n_head * d_k), f32),
        "w_vs": std_v * jax.random.normal(ks[2], (d_model, n_head * d_v), f32),
        "b_qs": jax.random.uniform(ks[3], (n_head * d_k,), f32, -bnd_in, bnd_in),
        "b_ks": jax.random.uniform(ks[4], (n_head * d_k,), f32, -bnd_in, bnd_in),
        "b_vs": jax.random.uniform(ks[5], (n_head * d_v,), f32, -bnd_in, bnd_in),
        "w_fc": std_fc * jax.random.normal(ks[6], (n_head * d_v, d_model), f32),
        "b_fc": jax.random.uniform(ks[7], (d_model,), f32, -bnd_fc, bnd_fc),
        "ln_g": jnp.ones((d_model,), f32),
        "ln_b": jnp.zeros((d_model,), f32),
    }


# ---------------------------------------------------------------------------
# Full MultiHeadAttention forward (seq_len=None path)
# ---------------------------------------------------------------------------
def multi_head_attention(q, k, v, params, *, n_head, d_k, d_v):
    sz_b, len_q, d_model = q.shape
    _, len_k, _ = k.shape
    _, len_v, _ = v.shape

    q2 = q.reshape(sz_b * len_q, d_model)
    k2 = k.reshape(sz_b * len_k, d_model)
    v2 = v.reshape(sz_b * len_v, d_model)

    # Fused Q/K/V projection (single launch) when the sequence lengths match;
    # otherwise fall back to per-input tiled linears.
    if len_q == len_k == len_v:
        qp, kp, vp = qkv_projection(q2, k2, v2, params)
    else:
        qp = linear(q2, params["w_qs"], params["b_qs"])
        kp = linear(k2, params["w_ks"], params["b_ks"])
        vp = linear(v2, params["w_vs"], params["b_vs"])

    # Free (contiguous) reshapes only — no transposes; the head split/merge
    # happens inside kernel 2.
    qp = qp.reshape(sz_b, len_q, n_head * d_k)
    kp = kp.reshape(sz_b, len_k, n_head * d_k)
    vp = vp.reshape(sz_b, len_v, n_head * d_v)

    out, attn = attention_fc_layernorm(qp, kp, vp, q, params,
                                       n_head=n_head, d_k=d_k, d_v=d_v)

    # (n_head, sz_b, len_q, len_k) -> (n_head*sz_b, len_q, len_k): contiguous
    # head-major reshape, identical ordering to the PyTorch permute+view path.
    attn = attn.reshape(n_head * sz_b, len_q, len_k)
    return out, attn


# ---------------------------------------------------------------------------
if __name__ == "__main__":
    n_head, d_model, d_k, d_v = 4, 32, 8, 8
    sz_b, seq = 2, 8

    key = jax.random.PRNGKey(0)
    kq, kk, kv, kp = jax.random.split(key, 4)
    q = jax.random.normal(kq, (sz_b, seq, d_model), jnp.float32)
    k = jax.random.normal(kk, (sz_b, seq, d_model), jnp.float32)
    v = jax.random.normal(kv, (sz_b, seq, d_model), jnp.float32)

    params = init_params(kp, n_head, d_model, d_k, d_v)

    out, attn = multi_head_attention(q, k, v, params,
                                     n_head=n_head, d_k=d_k, d_v=d_v)
    jax.block_until_ready((out, attn))

    assert out.shape == (sz_b, seq, d_model)
    assert attn.shape == (n_head * sz_b, seq, seq)
    assert bool(jnp.all(jnp.isfinite(out)))
    assert bool(jnp.all(jnp.isfinite(attn)))
    print("KERNEL_OK")
</pallas_src>

<mosaic_0001>
module attributes {stable_mosaic.version = 11 : i64} {
  func.func @_qkv_proj_kernel(%arg0: i32, %arg1: memref<16x32xf32, #tpu.memory_space<vmem>>, %arg2: memref<16x32xf32, #tpu.memory_space<vmem>>, %arg3: memref<16x32xf32, #tpu.memory_space<vmem>>, %arg4: memref<32x32xf32, #tpu.memory_space<vmem>>, %arg5: memref<32x32xf32, #tpu.memory_space<vmem>>, %arg6: memref<32x32xf32, #tpu.memory_space<vmem>>, %arg7: memref<1x32xf32, #tpu.memory_space<vmem>>, %arg8: memref<1x32xf32, #tpu.memory_space<vmem>>, %arg9: memref<1x32xf32, #tpu.memory_space<vmem>>, %arg10: memref<16x32xf32, #tpu.memory_space<vmem>>, %arg11: memref<16x32xf32, #tpu.memory_space<vmem>>, %arg12: memref<16x32xf32, #tpu.memory_space<vmem>>) attributes {dimension_semantics = [#tpu.dimension_semantics<parallel>], iteration_bounds = array<i64: 1>, scalar_prefetch = 0 : i64, scratch_operands = 0 : i64, tpu.core_type = #tpu.core_type<tc>, window_params = [{transform_indices = @transform_0, window_bounds = array<i64: 16, 32>}, {transform_indices = @transform_1, window_bounds = array<i64: 16, 32>}, {transform_indices = @transform_2, window_bounds = array<i64: 16, 32>}, {pipeline_mode = #tpu.pipeline_mode<synchronous>, transform_indices = @transform_3, window_bounds = array<i64: 32, 32>}, {pipeline_mode = #tpu.pipeline_mode<synchronous>, transform_indices = @transform_4, window_bounds = array<i64: 32, 32>}, {pipeline_mode = #tpu.pipeline_mode<synchronous>, transform_indices = @transform_5, window_bounds = array<i64: 32, 32>}, {pipeline_mode = #tpu.pipeline_mode<synchronous>, transform_indices = @transform_6, window_bounds = array<i64: 1, 32>}, {pipeline_mode = #tpu.pipeline_mode<synchronous>, transform_indices = @transform_7, window_bounds = array<i64: 1, 32>}, {pipeline_mode = #tpu.pipeline_mode<synchronous>, transform_indices = @transform_8, window_bounds = array<i64: 1, 32>}, {transform_indices = @transform_9, window_bounds = array<i64: 16, 32>}, {transform_indices = @transform_10, window_bounds = array<i64: 16, 32>}, {transform_indices = @transform_11, window_bounds = array<i64: 16, 32>}]} {
    %c0 = arith.constant 0 : index
    %c0_0 = arith.constant 0 : index
    %0 = vector.load %arg1[%c0, %c0_0] : memref<16x32xf32, #tpu.memory_space<vmem>>, vector<16x32xf32>
    %c0_1 = arith.constant 0 : index
    %c0_2 = arith.constant 0 : index
    %1 = vector.load %arg4[%c0_1, %c0_2] : memref<32x32xf32, #tpu.memory_space<vmem>>, vector<32x32xf32>
    %cst = arith.constant dense<0.000000e+00> : vector<16x32xf32>
    %2 = tpu.matmul %0, %1, %cst {dimension_numbers = #tpu.dot_dimension_numbers<[1], [0], [0], [1], [0, 0, 1, 1], [], []>} : vector<16x32xf32>, vector<32x32xf32>, vector<16x32xf32> -> vector<16x32xf32>
    %c0_3 = arith.constant 0 : index
    %c0_4 = arith.constant 0 : index
    %3 = vector.load %arg7[%c0_3, %c0_4] : memref<1x32xf32, #tpu.memory_space<vmem>>, vector<1x32xf32>
    %4 = vector.broadcast %3 : vector<1x32xf32> to vector<16x32xf32>
    %5 = arith.addf %2, %4 : vector<16x32xf32>
    %c0_5 = arith.constant 0 : index
    %c0_6 = arith.constant 0 : index
    %6 = vector.load %arg10[%c0_5, %c0_6] : memref<16x32xf32, #tpu.memory_space<vmem>>, vector<16x32xf32>
    tpu.vector_store %arg10[%c0_5, %c0_6], %5 {strides = array<i32>} : memref<16x32xf32, #tpu.memory_space<vmem>>, vector<16x32xf32>,
    %c0_7 = arith.constant 0 : index
    %c0_8 = arith.constant 0 : index
    %7 = vector.load %arg2[%c0_7, %c0_8] : memref<16x32xf32, #tpu.memory_space<vmem>>, vector<16x32xf32>
    %c0_9 = arith.constant 0 : index
    %c0_10 = arith.constant 0 : index
    %8 = vector.load %arg5[%c0_9, %c0_10] : memref<32x32xf32, #tpu.memory_space<vmem>>, vector<32x32xf32>
    %cst_11 = arith.constant dense<0.000000e+00> : vector<16x32xf32>
    %9 = tpu.matmul %7, %8, %cst_11 {dimension_numbers = #tpu.dot_dimension_numbers<[1], [0], [0], [1], [0, 0, 1, 1], [], []>} : vector<16x32xf32>, vector<32x32xf32>, vector<16x32xf32> -> vector<16x32xf32>
    %c0_12 = arith.constant 0 : index
    %c0_13 = arith.constant 0 : index
    %10 = vector.load %arg8[%c0_12, %c0_13] : memref<1x32xf32, #tpu.memory_space<vmem>>, vector<1x32xf32>
    %11 = vector.broadcast %10 : vector<1x32xf32> to vector<16x32xf32>
    %12 = arith.addf %9, %11 : vector<16x32xf32>
    %c0_14 = arith.constant 0 : index
    %c0_15 = arith.constant 0 : index
    %13 = vector.load %arg11[%c0_14, %c0_15] : memref<16x32xf32, #tpu.memory_space<vmem>>, vector<16x32xf32>
    tpu.vector_store %arg11[%c0_14, %c0_15], %12 {strides = array<i32>} : memref<16x32xf32, #tpu.memory_space<vmem>>, vector<16x32xf32>,
    %c0_16 = arith.constant 0 : index
    %c0_17 = arith.constant 0 : index
    %14 = vector.load %arg3[%c0_16, %c0_17] : memref<16x32xf32, #tpu.memory_space<vmem>>, vector<16x32xf32>
    %c0_18 = arith.constant 0 : index
    %c0_19 = arith.constant 0 : index
    %15 = vector.load %arg6[%c0_18, %c0_19] : memref<32x32xf32, #tpu.memory_space<vmem>>, vector<32x32xf32>
    %cst_20 = arith.constant dense<0.000000e+00> : vector<16x32xf32>
    %16 = tpu.matmul %14, %15, %cst_20 {dimension_numbers = #tpu.dot_dimension_numbers<[1], [0], [0], [1], [0, 0, 1, 1], [], []>} : vector<16x32xf32>, vector<32x32xf32>, vector<16x32xf32> -> vector<16x32xf32>
    %c0_21 = arith.constant 0 : index
    %c0_22 = arith.constant 0 : index
    %17 = vector.load %arg9[%c0_21, %c0_22] : memref<1x32xf32, #tpu.memory_space<vmem>>, vector<1x32xf32>
    %18 = vector.broadcast %17 : vector<1x32xf32> to vector<16x32xf32>
    %19 = arith.addf %16, %18 : vector<16x32xf32>
    %c0_23 = arith.constant 0 : index
    %c0_24 = arith.constant 0 : index
    %20 = vector.load %arg12[%c0_23, %c0_24] : memref<16x32xf32, #tpu.memory_space<vmem>>, vector<16x32xf32>
    tpu.vector_store %arg12[%c0_23, %c0_24], %19 {strides = array<i32>} : memref<16x32xf32, #tpu.memory_space<vmem>>, vector<16x32xf32>,
    return
  }
  func.func @transform_0(%arg0: i32) -> (i32, i32) {
    %c0_i32 = arith.constant 0 : i32
    %c0_i32_0 = arith.constant 0 : i32
    return %arg0, %c0_i32 : i32, i32
  }
  func.func @transform_1(%arg0: i32) -> (i32, i32) {
    %c0_i32 = arith.constant 0 : i32
    %c0_i32_0 = arith.constant 0 : i32
    return %arg0, %c0_i32 : i32, i32
  }
  func.func @transform_2(%arg0: i32) -> (i32, i32) {
    %c0_i32 = arith.constant 0 : i32
    %c0_i32_0 = arith.constant 0 : i32
    return %arg0, %c0_i32 : i32, i32
  }
  func.func @transform_3(%arg0: i32) -> (i32, i32) {
    %c0_i32 = arith.constant 0 : i32
    %c0_i32_0 = arith.constant 0 : i32
    %c0_i32_1 = arith.constant 0 : i32
    return %c0_i32, %c0_i32_0 : i32, i32
  }
  func.func @transform_4(%arg0: i32) -> (i32, i32) {
    %c0_i32 = arith.constant 0 : i32
    %c0_i32_0 = arith.constant 0 : i32
    %c0_i32_1 = arith.constant 0 : i32
    return %c0_i32, %c0_i32_0 : i32, i32
  }
  func.func @transform_5(%arg0: i32) -> (i32, i32) {
    %c0_i32 = arith.constant 0 : i32
    %c0_i32_0 = arith.constant 0 : i32
    %c0_i32_1 = arith.constant 0 : i32
    return %c0_i32, %c0_i32_0 : i32, i32
  }
  func.func @transform_6(%arg0: i32) -> (i32, i32) {
    %c0_i32 = arith.constant 0 : i32
    %c0_i32_0 = arith.constant 0 : i32
    %c0_i32_1 = arith.constant 0 : i32
    return %c0_i32, %c0_i32_0 : i32, i32
  }
  func.func @transform_7(%arg0: i32) -> (i32, i32) {
    %c0_i32 = arith.constant 0 : i32
    %c0_i32_0 = arith.constant 0 : i32
    %c0_i32_1 = arith.constant 0 : i32
    return %c0_i32, %c0_i32_0 : i32, i32
  }
  func.func @transform_8(%arg0: i32) -> (i32, i32) {
    %c0_i32 = arith.constant 0 : i32
    %c0_i32_0 = arith.constant 0 : i32
    %c0_i32_1 = arith.constant 0 : i32
    return %c0_i32, %c0_i32_0 : i32, i32
  }
  func.func @transform_9(%arg0: i32) -> (i32, i32) {
    %c0_i32 = arith.constant 0 : i32
    %c0_i32_0 = arith.constant 0 : i32
    return %arg0, %c0_i32 : i32, i32
  }
  func.func @transform_10(%arg0: i32) -> (i32, i32) {
    %c0_i32 = arith.constant 0 : i32
    %c0_i32_0 = arith.constant 0 : i32
    return %arg0, %c0_i32 : i32, i32
  }
  func.func @transform_11(%arg0: i32) -> (i32, i32) {
    %c0_i32 = arith.constant 0 : i32
    %c0_i32_0 = arith.constant 0 : i32
    return %arg0, %c0_i32 : i32, i32
  }
}

</mosaic_0001>

<bundles_post_ra>
// kernel: tpu_custom_call.1
= control target key start
LH: loop header
LB: loop body
LE: loop exit
PB: predicated region body
PF: predicated region fallthrough
CT: control target
= control target key end

     0   :  { %17 = vsyncpa [#allocation3], 0  ;;  %s868_s0 = inlined_call_operand.hbm [shape: f32[16,32], index: 0, kind: input, shape index: {}]   ;;  %s869_s1 = inlined_call_operand.hbm [shape: f32[16,32], index: 1, kind: input, shape index: {}]   ;;  %s870_s2 = inlined_call_operand.hbm [shape: f32[16,32], index: 2, kind: input, shape index: {}]   ;;  %s871_s3 = inlined_call_operand.hbm [shape: f32[32,32], index: 3, kind: input, shape index: {}]   ;;  %s872_s4 = inlined_call_operand.hbm [shape: f32[32,32], index: 4, kind: input, shape index: {}]   ;;  %s873_s5 = inlined_call_operand.hbm [shape: f32[32,32], index: 5, kind: input, shape index: {}]   ;;  %s874_s6 = inlined_call_operand.vmem [shape: f32[1,32], index: 6, kind: input, shape index: {}]   ;;  %s875_s7 = inlined_call_operand.vmem [shape: f32[1,32], index: 7, kind: input, shape index: {}]   ;;  %s876_s8 = inlined_call_operand.vmem [shape: f32[1,32], index: 8, kind: input, shape index: {}]   ;;  %s877_s9 = inlined_call_operand.hbm [shape: f32[16,32], index: 9, kind: output, shape index: {0}]   ;;  %s878_s10 = inlined_call_operand.hbm [shape: f32[16,32], index: 10, kind: output, shape index: {1}]   ;;  %s879_s11 = inlined_call_operand.hbm [shape: f32[16,32], index: 11, kind: output, shape index: {2}]  }
   0x1   :  { %18 = vsyncpa [#allocation6], 0 }
   0x2   :  { %19 = vsyncpa [#allocation9], 0 }
   0x3   :  { %20 = vsyncpa [#allocation12], 0 }
   0x4   :  { %21 = vsyncpa [#allocation4], 0 }
   0x5   :  { %22 = vsyncpa [#allocation15], 0  ;;  %s722_s17 = smov [#allocation5]   ;;  %s723_s19 = smov [#allocation8]  }
   0x6   :  { %s40_s18 = sshll.u32 %s722_s17, 4  ;;  %s64_s20 = sshll.u32 %s723_s19, 4  ;;  %s41_s18 = int_to_ptr.vmem [resolvable:$true] %s40_s18  ;;  %s65_s20 = int_to_ptr.vmem [resolvable:$true] %s64_s20 }
   0x7   :  { %s538_s21 = scalar_lea.vmem %s41_s18, 256  ;;  %p543_p1 = scmp.lt.s32.totalorder %s41_s18, %s41_s18 }
   0x8   :  { %p539_p0 = scmp.ne.s32.totalorder %s41_s18, %s538_s21  ;;  %p544_p2 = scmp.lt.s32.totalorder %s538_s21, %s538_s21 }
   0xa   :  { %p545_p3 = por %p544_p2, %p543_p1 }
   0xc   :  { %p546_p4 = pnand %p545_p3, %p539_p0 }
   0xe   :  { %549 = shalt.err (!%p546_p4)
}
   0xf   :  { %s724_s22 = smov 128   ;;  %s725_s23 = smov 8  }
  0x10   :  { %46 = dma.hbm_to_vmem [thread:$0]  %s869_s1, 256, %s41_s18, [#allocation6], %s724_s22, %s724_s22, %s725_s23  }
  0x11   :  { %s558_s26 = scalar_lea.vmem %s65_s20, 512  ;;  %p563_p6 = scmp.lt.s32.totalorder %s65_s20, %s65_s20 }
  0x12   :  { %p559_p5 = scmp.ne.s32.totalorder %s65_s20, %s558_s26  ;;  %p564_p7 = scmp.lt.s32.totalorder %s558_s26, %s558_s26 }
  0x14   :  { %p565_p8 = por %p564_p7, %p563_p6 }
  0x16   :  { %p566_p9 = pnand %p565_p8, %p559_p5 }
  0x18   :  { %569 = shalt.err (!%p566_p9)
}
  0x19   :  { %70 = dma.hbm_to_vmem [thread:$0]  %s871_s3, 512, %s65_s20, [#allocation9], %s724_s22, %s724_s22, %s725_s23  }
  0x1a   :  { %s726_s29 = smov [#allocation2]   ;;  %s727_s12 = smov [#allocation7]  }
  0x1b   :  { %s28_s30 = sshll.u32 %s726_s29, 4  ;;  %s52_s13 = sshll.u32 %s727_s12, 4  ;;  %s29_s30 = int_to_ptr.vmem [resolvable:$true] %s28_s30  ;;  %s53_s13 = int_to_ptr.vmem [resolvable:$true] %s52_s13 }
  0x1c   :  { %s578_s1 = scalar_lea.vmem %s29_s30, 256  ;;  %p583_p11 = scmp.lt.s32.totalorder %s29_s30, %s29_s30 }
  0x1d   :  { %p579_p10 = scmp.ne.s32.totalorder %s29_s30, %s578_s1  ;;  %p584_p12 = scmp.lt.s32.totalorder %s578_s1, %s578_s1 }
  0x1f   :  { %p585_p13 = por %p584_p12, %p583_p11 }
  0x21   :  { %p586_p0 = pnand %p585_p13, %p579_p10 }
  0x23   :  { %589 = shalt.err (!%p586_p0)
}
  0x24   :  { %34 = dma.hbm_to_vmem [thread:$0]  %s868_s0, 256, %s29_s30, [#allocation3], %s724_s22, %s724_s22, %s725_s23  }
  0x25   :  { %s598_s3 = scalar_lea.vmem %s53_s13, 256  ;;  %p603_p2 = scmp.lt.s32.totalorder %s53_s13, %s53_s13 }
  0x26   :  { %p599_p1 = scmp.ne.s32.totalorder %s53_s13, %s598_s3  ;;  %p604_p3 = scmp.lt.s32.totalorder %s598_s3, %s598_s3 }
  0x28   :  { %p605_p4 = por %p604_p3, %p603_p2 }
  0x2a   :  { %p606_p5 = pnand %p605_p4, %p599_p1 }
  0x2c   :  { %609 = shalt.err (!%p606_p5)
}
  0x2d   :  { %58 = dma.hbm_to_vmem [thread:$0]  %s870_s2, 256, %s53_s13, [#allocation6], %s724_s22, %s724_s22, %s725_s23  }
  0x2e   :  { %s728_s18 = smov [#allocation10]   ;;  %s729_s20 = smov [#allocation11]  }
  0x2f   :  { %s76_s19 = sshll.u32 %s728_s18, 4  ;;  %s88_s21 = sshll.u32 %s729_s20, 4  ;;  %s77_s19 = int_to_ptr.vmem [resolvable:$true] %s76_s19  ;;  %s89_s21 = int_to_ptr.vmem [resolvable:$true] %s88_s21 }
  0x30   :  { %s618_s0 = scalar_lea.vmem %s77_s19, 512  ;;  %p623_p7 = scmp.lt.s32.totalorder %s77_s19, %s77_s19 }
  0x31   :  { %p619_p6 = scmp.ne.s32.totalorder %s77_s19, %s618_s0  ;;  %p624_p8 = scmp.lt.s32.totalorder %s618_s0, %s618_s0 }
  0x33   :  { %p625_p9 = por %p624_p8, %p623_p7 }
  0x35   :  { %p626_p10 = pnand %p625_p9, %p619_p6 }
  0x37   :  { %629 = shalt.err (!%p626_p10)
}
  0x38   :  { %82 = dma.hbm_to_vmem [thread:$0]  %s872_s4, 512, %s77_s19, [#allocation9], %s724_s22, %s724_s22, %s725_s23  }
  0x39   :  { %s638_s2 = scalar_lea.vmem %s89_s21, 512  ;;  %p643_p12 = scmp.lt.s32.totalorder %s89_s21, %s89_s21 }
  0x3a   :  { %p639_p11 = scmp.ne.s32.totalorder %s89_s21, %s638_s2  ;;  %p644_p13 = scmp.lt.s32.totalorder %s638_s2, %s638_s2 }
  0x3c   :  { %p645_p0 = por %p644_p13, %p643_p12 }
  0x3e   :  { %p646_p1 = pnand %p645_p0, %p639_p11 }
  0x40   :  { %649 = shalt.err (!%p646_p1)
}
  0x41   :  { %94 = dma.hbm_to_vmem [thread:$0]  %s873_s5, 512, %s89_s21, [#allocation12], %s724_s22, %s724_s22, %s725_s23  }
  0x42   :  { %710 = dma.done.wait [#allocation3], 256  }
  0x43   :  { %711 = vsyncadd [#allocation3], 4294967040 }
  0x44   :  { %712 = dma.done.wait [#allocation6], 512  }
  0x45   :  { %713 = vsyncadd [#allocation6], 4294966784 }
  0x46   :  { %714 = dma.done.wait [#allocation9], 1024  }
  0x47   :  { %715 = vsyncadd [#allocation9], 4294966272 }
  0x48   :  { %716 = dma.done.wait [#allocation12], 512  }
  0x49   :  { %717 = vsyncadd [#allocation12], 4294966784  ;;  %v124_v0 = vld [vmem:[#allocation8 + $0x18] sm:$0xff]  ;;  %v123_v1 = vld [vmem:[#allocation8 + $0x10] sm:$0xff]  ;;  %vm132_vm0 = vcmask 261120   ;;  %s730_s28 = smov [#allocation13]  }
  0x4a   :  { %486 = vmatprep.subr.mxu0 %v124_v0  ;;  %v221_v2 = vld [vmem:[#allocation10 + $0x18] sm:$0xff]  ;;  %v119_v3 = vld [vmem:[#allocation2] sm:$0xff]  ;;  %v122_v4 = vld [vmem:[#allocation8 + $0x8] sm:$0xff]  ;;  %s413_s29 = sshll.u32 %s730_s28, 4  ;;  %s731_s13 = smov [#allocation14]   ;;  %s414_s29 = int_to_ptr.vmem [resolvable:$true] %s413_s29 }
  0x4b   :  { %487 = vmatpush3.msra.mxu0 %v124_v0  ;;  %497 = vmatprep.subr.mxu1 %v221_v2  ;;  %v220_v5 = vld [vmem:[#allocation10 + $0x10] sm:$0xff]  ;;  %v121_v6 = vld [vmem:[#allocation8] sm:$0xff]  ;;  %v219_v7 = vld [vmem:[#allocation10 + $0x8] sm:$0xff]  ;;  %s425_s1 = sshll.u32 %s731_s13, 4  ;;  %s650_s15 = scalar_lea.vmem %s414_s29, 256  ;;  %s426_s1 = int_to_ptr.vmem [resolvable:$true] %s425_s1 }
  0x4c   :  { %488 = vmatprep.subr.mxu0 %v123_v1  ;;  %498 = vmatpush3.msra.mxu1 %v221_v2  ;;  %v120_v8 = vld [vmem:[#allocation2 + $0x8] sm:$0xff]  ;;  %v218_v10 = vld [vmem:[#allocation10] sm:$0xff]  ;;  %v316_v11 = vld [vmem:[#allocation11 + $0x10] sm:$0xff]  ;;  %p651_p2 = scmp.ne.s32.totalorder %s414_s29, %s650_s15  ;;  %p655_p3 = scmp.lt.s32.totalorder %s414_s29, %s414_s29 }
  0x4d   :  { %489 = vmatpush3.msra.mxu0 %v123_v1  ;;  %494 = vmatprep.mubr.msk.f32.mxu0 %vm132_vm0, %v119_v3  ;;  %v317_v9 = vld [vmem:[#allocation11 + $0x18] sm:$0xff]  ;;  %v216_v12 = vld [vmem:[#allocation5] sm:$0xff]  ;;  %v315_v13 = vld [vmem:[#allocation11 + $0x8] sm:$0xff]  ;;  %p656_p4 = scmp.lt.s32.totalorder %s650_s15, %s650_s15 }
  0x4e   :  { %490 = vmatprep.subr.mxu0 %v122_v4  ;;  %499 = vmatprep.subr.mxu1 %v220_v5  ;;  %v217_v14 = vld [vmem:[#allocation5 + $0x8] sm:$0xff]  ;;  %v312_v15 = vld [vmem:[#allocation7] sm:$0xff]  ;;  %v314_v16 = vld [vmem:[#allocation11] sm:$0xff] }
  0x4f   :  { %491 = vmatpush3.msra.mxu0 %v122_v4  ;;  %500 = vmatpush3.msra.mxu1 %v220_v5  ;;  %v313_v17 = vld [vmem:[#allocation7 + $0x8] sm:$0xff]  ;;  %v459_v18 = vld [vmem:[%s874_s6] ss:$0 sm:$0xff]  ;;  %p657_p5 = por %p656_p4, %p655_p3 }
  0x50   :  { %492 = vmatprep.subr.mxu0 %v121_v6  ;;  %501 = vmatprep.subr.mxu1 %v219_v7  ;;  %v462_v22 = vld [vmem:[%s875_s7] ss:$0 sm:$0xff] }
  0x51   :  { %493 = vmatpush3.msra.mxu0 %v121_v6  ;;  %502 = vmatpush3.msra.mxu1 %v219_v7  ;;  %v465_v26 = vld [vmem:[%s876_s8] ss:$0 sm:$0xff]  ;;  %p658_p6 = pnand %p657_p5, %p651_p2 }
  0x52   :  { %495 = vmatmul.mubr.msk.f32.vlgmr.msra.gmra.mxu0 %vm132_vm0, %v120_v8  ;;  %508 = vmatprep.subr.mxu0 %v317_v9 }
  0x53   :  { %509 = vmatpush3.msra.mxu0 %v317_v9  ;;  %503 = vmatprep.subr.mxu1 %v218_v10 }
  0x54   :  { %510 = vmatprep.subr.mxu0 %v316_v11  ;;  %504 = vmatpush3.msra.mxu1 %v218_v10 }
  0x55   :  { %511 = vmatpush3.msra.mxu0 %v316_v11  ;;  %505 = vmatprep.mubr.msk.f32.mxu1 %vm132_vm0, %v216_v12 }
  0x56   :  { %512 = vmatprep.subr.mxu0 %v315_v13  ;;  %506 = vmatmul.mubr.msk.f32.vlgmr.msra.gmra.mxu1 %vm132_vm0, %v217_v14 }
  0x57   :  { %513 = vmatpush3.msra.mxu0 %v315_v13  ;;  %516 = vmatprep.mubr.msk.f32.mxu0 %vm132_vm0, %v312_v15 }
  0x58   :  { %514 = vmatprep.subr.mxu0 %v314_v16 }
  0x59   :  { %515 = vmatpush3.msra.mxu0 %v314_v16 }
  0x5a   :  { %517 = vmatmul.mubr.msk.f32.vlgmr.msra.gmra.mxu0 %vm132_vm0, %v313_v17 }
 0x112   :  { %v496_v19 = vpop.f32.mrf.mxu0 }
 0x113   :  { %v211_v20 = vadd.f32 %v496_v19, %v459_v18 }
 0x114   :  { %v205_v21 = vpop.f32.mrf.mxu0 }
 0x115   :  { %215 = vst.msk [vmem:[#allocation13 + $0x8] sm:$0xff] %vm132_vm0, %v211_v20  ;;  %v206_v23 = vadd.f32 %v459_v18, %v205_v21 }
 0x116   :  { %v507_v24 = vpop.f32.mrf.mxu1 }
 0x117   :  { %214 = vst.msk [vmem:[#allocation13] sm:$0xff] %vm132_vm0, %v206_v23  ;;  %v307_v25 = vadd.f32 %v507_v24, %v462_v22 }
 0x118   :  { %v301_v27 = vpop.f32.mrf.mxu1 }
 0x119   :  { %661 = shalt.err (!%p658_p6)
}
 0x11a   :  { %419 = dma.vmem_to_hbm [thread:$0]  %s414_s29, 256, %s877_s9, [#allocation4], %s724_s22, %s724_s22, %s725_s23   ;;  %311 = vst.msk [vmem:[#allocation14 + $0x8] sm:$0xff] %vm132_vm0, %v307_v25  ;;  %v302_v28 = vadd.f32 %v462_v22, %v301_v27  ;;  %v518_v29 = vpop.f32.mrf.mxu0 }
 0x11b   :  { %s732_s8 = smov [#allocation16]   ;;  %v403_v30 = vadd.f32 %v518_v29, %v465_v26  ;;  %s670_s17 = scalar_lea.vmem %s426_s1, 256 }
 0x11c   :  { %s437_s16 = sshll.u32 %s732_s8, 4  ;;  %310 = vst.msk [vmem:[#allocation14] sm:$0xff] %vm132_vm0, %v302_v28  ;;  %v397_v31 = vpop.f32.mrf.mxu0  ;;  %p671_p7 = scmp.ne.s32.totalorder %s426_s1, %s670_s17  ;;  %s438_s16 = int_to_ptr.vmem [resolvable:$true] %s437_s16 }
 0x11d   :  { %p675_p8 = scmp.lt.s32.totalorder %s426_s1, %s426_s1  ;;  %p676_p9 = scmp.lt.s32.totalorder %s670_s17, %s670_s17 }
 0x11f   :  { %p677_p10 = por %p676_p9, %p675_p8 }
 0x121   :  { %p678_p11 = pnand %p677_p10, %p671_p7 }
 0x123   :  { %681 = shalt.err (!%p678_p11)
}
 0x124   :  { %431 = dma.vmem_to_hbm [thread:$0]  %s426_s1, 256, %s878_s10, [#allocation15], %s724_s22, %s724_s22, %s725_s23   ;;  %407 = vst.msk [vmem:[#allocation16 + $0x8] sm:$0xff] %vm132_vm0, %v403_v30  ;;  %v398_v32 = vadd.f32 %v465_v26, %v397_v31 }
 0x125   :  { %s690_s19 = scalar_lea.vmem %s438_s16, 256  ;;  %p695_p13 = scmp.lt.s32.totalorder %s438_s16, %s438_s16 }
 0x126   :  { %406 = vst.msk [vmem:[#allocation16] sm:$0xff] %vm132_vm0, %v398_v32  ;;  %p691_p12 = scmp.ne.s32.totalorder %s438_s16, %s690_s19  ;;  %p696_p0 = scmp.lt.s32.totalorder %s690_s19, %s690_s19 }
 0x128   :  { %p697_p1 = por %p696_p0, %p695_p13 }
 0x12a   :  { %p698_p2 = pnand %p697_p1, %p691_p12 }
 0x12c   :  { %701 = shalt.err (!%p698_p2)
}
 0x12d   :  { %443 = dma.vmem_to_hbm [thread:$0]  %s438_s16, 256, %s879_s11, [#allocation15], %s724_s22, %s724_s22, %s725_s23  }
 0x12e   :  { %718 = dma.done.wait [#allocation4], 256  }
 0x12f   :  { %719 = vsyncadd [#allocation4], 4294967040 }
 0x130   :  { %720 = dma.done.wait [#allocation15], 512  }
 0x131   :  { %721 = vsyncadd [#allocation15], 4294966784 }
 0x132   :  { %453 = vsyncpa [#allocation3], 1 }
 0x133   :  { %454 = vsyncpa [#allocation6], 1 }
 0x134   :  { %455 = vsyncpa [#allocation9], 1 }
 0x135   :  { %456 = vsyncpa [#allocation12], 1 }
 0x136   :  { %457 = vsyncpa [#allocation4], 1 }
 0x137   :  { %458 = vsyncpa [#allocation15], 1 }

</bundles_post_ra>
